<compile_context>
chip_gen: v6e
topology: v6e:2x2x1
jax: 0.10.0
libtpu: 0.0.40
codegen_flags: <defaults>
</compile_context>

<pallas_src>
import jax
import jax.numpy as jnp
from jax.experimental import pallas as pl
from jax.experimental.pallas import tpu as pltpu


def _softplus_t20(z):
    """PyTorch Softplus(beta=1, threshold=20); min() keeps the untaken exp finite."""
    return jnp.where(z > 20.0, z, jnp.log1p(jnp.exp(jnp.minimum(z, 20.0))))


def _fused_mlp_kernel(x_ref, w1_ref, b1_ref, w2_ref, b2_ref, w3_ref, b3_ref,
                      o_ref):
    """softplus(softplus(softplus(x@W1+b1)@W2+b2)@W3+b3), all operands in VMEM."""
    h = _softplus_t20(
        jnp.dot(x_ref[...], w1_ref[...], preferred_element_type=jnp.float32)
        + b1_ref[...]
    )
    h = _softplus_t20(
        jnp.dot(h, w2_ref[...], preferred_element_type=jnp.float32)
        + b2_ref[...]
    )
    z = _softplus_t20(
        jnp.dot(h, w3_ref[...], preferred_element_type=jnp.float32)
        + b3_ref[...]
    )
    o_ref[...] = z.astype(o_ref.dtype)


@jax.jit
def fused_mlp(x, w1, b1, w2, b2, w3, b3):
    """Fused 3-layer MLP with Softplus.  x:(B,K) -> (B, N_out)."""
    B, K = x.shape
    assert w1.shape[0] == K
    H1 = w1.shape[1]
    assert w2.shape == (H1, H1)
    N_out = w3.shape[1]
    assert w3.shape[0] == H1

    # Pad batch rows up to a multiple of 8 (f32 sublane) for dense vregs /
    # unmasked stores; padded rows are discarded after the call.
    B_pad = max(8, ((B + 7) // 8) * 8)
    if B_pad != B:
        x = jnp.pad(x, ((0, B_pad - B), (0, 0)))

    vmem = pl.BlockSpec(memory_space=pltpu.MemorySpace.VMEM)
    out = pl.pallas_call(
        _fused_mlp_kernel,
        out_shape=jax.ShapeDtypeStruct((B_pad, N_out), x.dtype),
        in_specs=[vmem] * 7,
        out_specs=vmem,
    )(x, w1, b1.reshape(1, H1), w2, b2.reshape(1, H1), w3,
      b3.reshape(1, N_out))
    return out[:B]


class DepthEstimationModelPallas:
    """JAX/Pallas port of the PyTorch DepthEstimationModel (scaled-down dims)."""

    def __init__(self, key, c=3, h=16, w=16, hidden=128, dtype=jnp.float32):
        self.c, self.h, self.w = c, h, w
        d_in = c * h * w
        d_out = h * w
        k1, k2, k3, k4, k5, k6 = jax.random.split(key, 6)

        # Deterministic synthetic init (uniform, roughly nn.Linear's fan-in
        # scaling). Not a checkpoint load.
        def lin_init(kw, kb, fan_in, fan_out):
            bound = 1.0 / (fan_in ** 0.5)
            W = jax.random.uniform(kw, (fan_in, fan_out), dtype, -bound, bound)
            bvec = jax.random.uniform(kb, (fan_out,), dtype, -bound, bound)
            return W, bvec

        self.w1, self.b1 = lin_init(k1, k2, d_in, hidden)
        self.w2, self.b2 = lin_init(k3, k4, hidden, hidden)
        self.w3, self.b3 = lin_init(k5, k6, hidden, d_out)

    def __call__(self, x):
        # x: (B, C, H, W) NCHW, same as PyTorch. Flatten like x.view(B, -1).
        B = x.shape[0]
        xf = x.reshape(B, -1)
        y = fused_mlp(xf, self.w1, self.b1, self.w2, self.b2, self.w3, self.b3)
        return y.reshape(B, self.h, self.w)


def _reference(model, x):
    """Pure-JAX reference for correctness checking."""
    B = x.shape[0]
    xf = x.reshape(B, -1)
    h = _softplus_t20(xf @ model.w1 + model.b1)
    h = _softplus_t20(h @ model.w2 + model.b2)
    h = _softplus_t20(h @ model.w3 + model.b3)
    return h.reshape(B, model.h, model.w)


if __name__ == "__main__":
    key = jax.random.PRNGKey(0)
    kx, kp = jax.random.split(key)

    # Small shapes consistent with the module's forward:
    # batch=2, channels=3 (as in the original), spatial=16, hidden=128.
    B, C, H, W = 2, 3, 16, 16
    x = jax.random.normal(kx, (B, C, H, W), dtype=jnp.float32)

    model = DepthEstimationModelPallas(kp, c=C, h=H, w=W, hidden=128)

    out = model(x)
    out = jax.block_until_ready(out)

    ref = _reference(model, x)
    assert out.shape == (B, H, W), out.shape
    assert jnp.allclose(out, ref, atol=1e-5, rtol=1e-5), "mismatch vs reference"

    print("KERNEL_OK")
</pallas_src>

<mosaic_0001>
module attributes {stable_mosaic.version = 11 : i64} {
  func.func @_fused_mlp_kernel(%arg0: memref<8x768xf32, #tpu.memory_space<vmem>>, %arg1: memref<768x128xf32, #tpu.memory_space<vmem>>, %arg2: memref<1x128xf32, #tpu.memory_space<vmem>>, %arg3: memref<128x128xf32, #tpu.memory_space<vmem>>, %arg4: memref<1x128xf32, #tpu.memory_space<vmem>>, %arg5: memref<128x256xf32, #tpu.memory_space<vmem>>, %arg6: memref<1x256xf32, #tpu.memory_space<vmem>>, %arg7: memref<8x256xf32, #tpu.memory_space<vmem>>) attributes {dimension_semantics = [], scalar_prefetch = 0 : i64, scratch_operands = 0 : i64, tpu.core_type = #tpu.core_type<tc>} {
    %c0 = arith.constant 0 : index
    %c0_0 = arith.constant 0 : index
    %0 = vector.load %arg0[%c0, %c0_0] : memref<8x768xf32, #tpu.memory_space<vmem>>, vector<8x768xf32>
    %c0_1 = arith.constant 0 : index
    %c0_2 = arith.constant 0 : index
    %1 = vector.load %arg1[%c0_1, %c0_2] : memref<768x128xf32, #tpu.memory_space<vmem>>, vector<768x128xf32>
    %cst = arith.constant dense<0.000000e+00> : vector<8x128xf32>
    %2 = tpu.matmul %0, %1, %cst {dimension_numbers = #tpu.dot_dimension_numbers<[1], [0], [0], [1], [0, 0, 1, 1], [], []>} : vector<8x768xf32>, vector<768x128xf32>, vector<8x128xf32> -> vector<8x128xf32>
    %c0_3 = arith.constant 0 : index
    %c0_4 = arith.constant 0 : index
    %3 = vector.load %arg2[%c0_3, %c0_4] : memref<1x128xf32, #tpu.memory_space<vmem>>, vector<1x128xf32>
    %4 = vector.broadcast %3 : vector<1x128xf32> to vector<8x128xf32>
    %5 = arith.addf %2, %4 : vector<8x128xf32>
    %cst_5 = arith.constant 2.000000e+01 : f32
    %6 = vector.broadcast %cst_5 : f32 to vector<8x128xf32>
    %7 = arith.cmpf ogt, %5, %6 : vector<8x128xf32>
    %cst_6 = arith.constant 2.000000e+01 : f32
    %8 = vector.broadcast %cst_6 : f32 to vector<8x128xf32>
    %9 = arith.minimumf %5, %8 : vector<8x128xf32>
    %10 = math.exp %9 : vector<8x128xf32>
    %11 = math.log1p %10 : vector<8x128xf32>
    %12 = arith.select %7, %5, %11 : vector<8x128xi1>, vector<8x128xf32>
    %c0_7 = arith.constant 0 : index
    %c0_8 = arith.constant 0 : index
    %13 = vector.load %arg3[%c0_7, %c0_8] : memref<128x128xf32, #tpu.memory_space<vmem>>, vector<128x128xf32>
    %cst_9 = arith.constant dense<0.000000e+00> : vector<8x128xf32>
    %14 = tpu.matmul %12, %13, %cst_9 {dimension_numbers = #tpu.dot_dimension_numbers<[1], [0], [0], [1], [0, 0, 1, 1], [], []>} : vector<8x128xf32>, vector<128x128xf32>, vector<8x128xf32> -> vector<8x128xf32>
    %c0_10 = arith.constant 0 : index
    %c0_11 = arith.constant 0 : index
    %15 = vector.load %arg4[%c0_10, %c0_11] : memref<1x128xf32, #tpu.memory_space<vmem>>, vector<1x128xf32>
    %16 = vector.broadcast %15 : vector<1x128xf32> to vector<8x128xf32>
    %17 = arith.addf %14, %16 : vector<8x128xf32>
    %cst_12 = arith.constant 2.000000e+01 : f32
    %18 = vector.broadcast %cst_12 : f32 to vector<8x128xf32>
    %19 = arith.cmpf ogt, %17, %18 : vector<8x128xf32>
    %cst_13 = arith.constant 2.000000e+01 : f32
    %20 = vector.broadcast %cst_13 : f32 to vector<8x128xf32>
    %21 = arith.minimumf %17, %20 : vector<8x128xf32>
    %22 = math.exp %21 : vector<8x128xf32>
    %23 = math.log1p %22 : vector<8x128xf32>
    %24 = arith.select %19, %17, %23 : vector<8x128xi1>, vector<8x128xf32>
    %c0_14 = arith.constant 0 : index
    %c0_15 = arith.constant 0 : index
    %25 = vector.load %arg5[%c0_14, %c0_15] : memref<128x256xf32, #tpu.memory_space<vmem>>, vector<128x256xf32>
    %cst_16 = arith.constant dense<0.000000e+00> : vector<8x256xf32>
    %26 = tpu.matmul %24, %25, %cst_16 {dimension_numbers = #tpu.dot_dimension_numbers<[1], [0], [0], [1], [0, 0, 1, 1], [], []>} : vector<8x128xf32>, vector<128x256xf32>, vector<8x256xf32> -> vector<8x256xf32>
    %c0_17 = arith.constant 0 : index
    %c0_18 = arith.constant 0 : index
    %27 = vector.load %arg6[%c0_17, %c0_18] : memref<1x256xf32, #tpu.memory_space<vmem>>, vector<1x256xf32>
    %28 = vector.broadcast %27 : vector<1x256xf32> to vector<8x256xf32>
    %29 = arith.addf %26, %28 : vector<8x256xf32>
    %cst_19 = arith.constant 2.000000e+01 : f32
    %30 = vector.broadcast %cst_19 : f32 to vector<8x256xf32>
    %31 = arith.cmpf ogt, %29, %30 : vector<8x256xf32>
    %cst_20 = arith.constant 2.000000e+01 : f32
    %32 = vector.broadcast %cst_20 : f32 to vector<8x256xf32>
    %33 = arith.minimumf %29, %32 : vector<8x256xf32>
    %34 = math.exp %33 : vector<8x256xf32>
    %35 = math.log1p %34 : vector<8x256xf32>
    %36 = arith.select %31, %29, %35 : vector<8x256xi1>, vector<8x256xf32>
    %c0_21 = arith.constant 0 : index
    %c0_22 = arith.constant 0 : index
    %37 = vector.load %arg7[%c0_21, %c0_22] : memref<8x256xf32, #tpu.memory_space<vmem>>, vector<8x256xf32>
    tpu.vector_store %arg7[%c0_21, %c0_22], %36 {strides = array<i32>} : memref<8x256xf32, #tpu.memory_space<vmem>>, vector<8x256xf32>,
    return
  }
}

</mosaic_0001>

<bundles_post_ra>
// kernel: fused_mlp.1
= control target key start
LH: loop header
LB: loop body
LE: loop exit
PB: predicated region body
PF: predicated region fallthrough
CT: control target
= control target key end

     0   :  { %12 = vsyncpa [#allocation3], 0  ;;  %s997_s0 = inlined_call_operand.vmem [shape: f32[8,768], index: 0, kind: input, shape index: {}]   ;;  %s998_s1 = inlined_call_operand.hbm [shape: f32[768,128], index: 1, kind: input, shape index: {}]   ;;  %s999_s2 = inlined_call_operand.vmem [shape: f32[1,128], index: 2, kind: input, shape index: {}]   ;;  %s1000_s3 = inlined_call_operand.hbm [shape: f32[128,128], index: 3, kind: input, shape index: {}]   ;;  %s1001_s4 = inlined_call_operand.vmem [shape: f32[1,128], index: 4, kind: input, shape index: {}]   ;;  %s1002_s5 = inlined_call_operand.hbm [shape: f32[128,256], index: 5, kind: input, shape index: {}]   ;;  %s1003_s6 = inlined_call_operand.vmem [shape: f32[1,256], index: 6, kind: input, shape index: {}]   ;;  %s1004_s7 = inlined_call_operand.vmem [shape: f32[8,256], index: 7, kind: output, shape index: {}]  }
   0x1   :  { %13 = vsyncpa [#allocation5], 0  ;;  %s906_s24 = smov [#allocation4]   ;;  %s907_s26 = smov [#allocation2]  }
   0x2   :  { %s35_s25 = sshll.u32 %s906_s24, 4  ;;  %s21_s27 = sshll.u32 %s907_s26, 4  ;;  %s36_s25 = int_to_ptr.vmem [resolvable:$true] %s35_s25  ;;  %s22_s27 = int_to_ptr.vmem [resolvable:$true] %s21_s27 }
   0x3   :  { %s850_s28 = scalar_lea.vmem %s36_s25, 2048  ;;  %p855_p1 = scmp.lt.s32.totalorder %s36_s25, %s36_s25 }
   0x4   :  { %p851_p0 = scmp.ne.s32.totalorder %s36_s25, %s850_s28  ;;  %p856_p2 = scmp.lt.s32.totalorder %s850_s28, %s850_s28 }
   0x6   :  { %p857_p3 = por %p856_p2, %p855_p1 }
   0x8   :  { %p858_p4 = pnand %p857_p3, %p851_p0 }
   0xa   :  { %861 = shalt.err (!%p858_p4)
}
   0xb   :  { %s908_s29 = smov 128   ;;  %s909_s30 = smov 8  }
   0xc   :  { %41 = dma.hbm_to_vmem [thread:$0]  %s1000_s3, 2048, %s36_s25, [#allocation5], %s908_s29, %s908_s29, %s909_s30  }
   0xd   :  { %s870_s10 = scalar_lea.vmem %s22_s27, 12288  ;;  %p875_p6 = scmp.lt.s32.totalorder %s22_s27, %s22_s27 }
   0xe   :  { %p871_p5 = scmp.ne.s32.totalorder %s22_s27, %s870_s10  ;;  %p876_p7 = scmp.lt.s32.totalorder %s870_s10, %s870_s10 }
  0x10   :  { %p877_p8 = por %p876_p7, %p875_p6 }
  0x12   :  { %p878_p9 = pnand %p877_p8, %p871_p5 }
  0x14   :  { %881 = shalt.err (!%p878_p9)
}
  0x15   :  { %27 = dma.hbm_to_vmem [thread:$0]  %s998_s1, 12288, %s22_s27, [#allocation3], %s908_s29, %s908_s29, %s909_s30  }
  0x16   :  { %s910_s13 = smov [#allocation6]  }
  0x17   :  { %s49_s14 = sshll.u32 %s910_s13, 4  ;;  %s50_s14 = int_to_ptr.vmem [resolvable:$true] %s49_s14 }
  0x18   :  { %s890_s15 = scalar_lea.vmem %s50_s14, 4096  ;;  %p895_p11 = scmp.lt.s32.totalorder %s50_s14, %s50_s14 }
  0x19   :  { %p891_p10 = scmp.ne.s32.totalorder %s50_s14, %s890_s15  ;;  %p896_p12 = scmp.lt.s32.totalorder %s890_s15, %s890_s15 }
  0x1b   :  { %p897_p13 = por %p896_p12, %p895_p11 }
  0x1d   :  { %p898_p0 = pnand %p897_p13, %p891_p10 }
  0x1f   :  { %901 = shalt.err (!%p898_p0)
}
  0x20   :  { %s911_s3 = smov 256   ;;  %s912_s16 = smov 16  }
  0x21   :  { %55 = dma.hbm_to_vmem [thread:$0]  %s1002_s5, 4096, %s50_s14, [#allocation5], %s911_s3, %s911_s3, %s912_s16  }
  0x22   :  { %902 = dma.done.wait [#allocation3], 12288  }
  0x23   :  { %903 = vsyncadd [#allocation3], 4294955008 }
  0x24   :  { %904 = dma.done.wait [#allocation5], 6144  }
  0x25   :  { %905 = vsyncadd [#allocation5], 4294961152  ;;  %v104_v0 = vld [vmem:[#allocation2 + $0xf8] sm:$0xff]  ;;  %v103_v2 = vld [vmem:[#allocation2 + $0xf0] sm:$0xff]  ;;  %vm914_vm0 = vmmov 0  }
  0x26   :  { %v88_v1 = vld [vmem:[#allocation2 + $0x78] sm:$0xff]  ;;  %660 = vmatprep.subr.mxu0 %v104_v0  ;;  %v87_v4 = vld [vmem:[#allocation2 + $0x70] sm:$0xff]  ;;  %v102_v6 = vld [vmem:[#allocation2 + $0xe8] sm:$0xff] }
  0x27   :  { %v136_v3 = vld [vmem:[#allocation2 + $0x1f8] sm:$0xff]  ;;  %661 = vmatpush3.msra.mxu0 %v88_v1  ;;  %v135_v7 = vld [vmem:[#allocation2 + $0x1f0] sm:$0xff]  ;;  %v86_v8 = vld [vmem:[#allocation2 + $0x68] sm:$0xff] }
  0x28   :  { %v120_v5 = vld [vmem:[#allocation2 + $0x178] sm:$0xff]  ;;  %695 = vmatprep.subr.mxu1 %v136_v3  ;;  %662 = vmatprep.subr.mxu0 %v103_v2  ;;  %v119_v9 = vld [vmem:[#allocation2 + $0x170] sm:$0xff]  ;;  %v134_v10 = vld [vmem:[#allocation2 + $0x1e8] sm:$0xff] }
  0x29   :  { %696 = vmatpush3.msra.mxu1 %v120_v5  ;;  %663 = vmatpush3.msra.mxu0 %v87_v4  ;;  %v101_v11 = vld [vmem:[#allocation2 + $0xe0] sm:$0xff]  ;;  %v118_v12 = vld [vmem:[#allocation2 + $0x168] sm:$0xff]  ;;  %v100_v15 = vld [vmem:[#allocation2 + $0xd8] sm:$0xff] }
  0x2a   :  { %697 = vmatprep.subr.mxu1 %v135_v7  ;;  %664 = vmatprep.subr.mxu0 %v102_v6  ;;  %v85_v13 = vld [vmem:[#allocation2 + $0x60] sm:$0xff]  ;;  %v84_v17 = vld [vmem:[#allocation2 + $0x58] sm:$0xff]  ;;  %v99_v19 = vld [vmem:[#allocation2 + $0xd0] sm:$0xff] }
  0x2b   :  { %698 = vmatpush3.msra.mxu1 %v119_v9  ;;  %v133_v14 = vld [vmem:[#allocation2 + $0x1e0] sm:$0xff]  ;;  %665 = vmatpush3.msra.mxu0 %v86_v8  ;;  %v132_v18 = vld [vmem:[#allocation2 + $0x1d8] sm:$0xff]  ;;  %v83_v21 = vld [vmem:[#allocation2 + $0x50] sm:$0xff] }
  0x2c   :  { %699 = vmatprep.subr.mxu1 %v134_v10  ;;  %v117_v16 = vld [vmem:[#allocation2 + $0x160] sm:$0xff]  ;;  %666 = vmatprep.subr.mxu0 %v101_v11  ;;  %v116_v20 = vld [vmem:[#allocation2 + $0x158] sm:$0xff]  ;;  %v131_v22 = vld [vmem:[#allocation2 + $0x1d0] sm:$0xff] }
  0x2d   :  { %700 = vmatpush3.msra.mxu1 %v118_v12  ;;  %667 = vmatpush3.msra.mxu0 %v85_v13  ;;  %v98_v23 = vld [vmem:[#allocation2 + $0xc8] sm:$0xff]  ;;  %v115_v24 = vld [vmem:[#allocation2 + $0x150] sm:$0xff]  ;;  %v97_v27 = vld [vmem:[#allocation2 + $0xc0] sm:$0xff] }
  0x2e   :  { %701 = vmatprep.subr.mxu1 %v133_v14  ;;  %668 = vmatprep.subr.mxu0 %v100_v15  ;;  %v82_v25 = vld [vmem:[#allocation2 + $0x48] sm:$0xff]  ;;  %v81_v29 = vld [vmem:[#allocation2 + $0x40] sm:$0xff]  ;;  %v96_v31 = vld [vmem:[#allocation2 + $0xb8] sm:$0xff] }
  0x2f   :  { %702 = vmatpush3.msra.mxu1 %v117_v16  ;;  %669 = vmatpush3.msra.mxu0 %v84_v17  ;;  %v130_v26 = vld [vmem:[#allocation2 + $0x1c8] sm:$0xff]  ;;  %v129_v30 = vld [vmem:[#allocation2 + $0x1c0] sm:$0xff]  ;;  %v80_v33 = vld [vmem:[#allocation2 + $0x38] sm:$0xff] }
  0x30   :  { %703 = vmatprep.subr.mxu1 %v132_v18  ;;  %670 = vmatprep.subr.mxu0 %v99_v19  ;;  %v114_v28 = vld [vmem:[#allocation2 + $0x148] sm:$0xff]  ;;  %v113_v32 = vld [vmem:[#allocation2 + $0x140] sm:$0xff]  ;;  %v128_v34 = vld [vmem:[#allocation2 + $0x1b8] sm:$0xff] }
  0x31   :  { %704 = vmatpush3.msra.mxu1 %v116_v20  ;;  %671 = vmatpush3.msra.mxu0 %v83_v21  ;;  %v95_v35 = vld [vmem:[#allocation2 + $0xb0] sm:$0xff]  ;;  %v112_v36 = vld [vmem:[#allocation2 + $0x138] sm:$0xff]  ;;  %v94_v39 = vld [vmem:[#allocation2 + $0xa8] sm:$0xff] }
  0x32   :  { %705 = vmatprep.subr.mxu1 %v131_v22  ;;  %672 = vmatprep.subr.mxu0 %v98_v23  ;;  %v79_v37 = vld [vmem:[#allocation2 + $0x30] sm:$0xff]  ;;  %v78_v41 = vld [vmem:[#allocation2 + $0x28] sm:$0xff]  ;;  %v93_v43 = vld [vmem:[#allocation2 + $0xa0] sm:$0xff] }
  0x33   :  { %706 = vmatpush3.msra.mxu1 %v115_v24  ;;  %673 = vmatpush3.msra.mxu0 %v82_v25  ;;  %v127_v38 = vld [vmem:[#allocation2 + $0x1b0] sm:$0xff]  ;;  %v126_v42 = vld [vmem:[#allocation2 + $0x1a8] sm:$0xff]  ;;  %v77_v45 = vld [vmem:[#allocation2 + $0x20] sm:$0xff] }
  0x34   :  { %707 = vmatprep.subr.mxu1 %v130_v26  ;;  %674 = vmatprep.subr.mxu0 %v97_v27  ;;  %v111_v40 = vld [vmem:[#allocation2 + $0x130] sm:$0xff]  ;;  %v110_v44 = vld [vmem:[#allocation2 + $0x128] sm:$0xff]  ;;  %v125_v46 = vld [vmem:[#allocation2 + $0x1a0] sm:$0xff] }
  0x35   :  { %708 = vmatpush3.msra.mxu1 %v114_v28  ;;  %675 = vmatpush3.msra.mxu0 %v81_v29  ;;  %v92_v47 = vld [vmem:[#allocation2 + $0x98] sm:$0xff]  ;;  %v109_v48 = vld [vmem:[#allocation2 + $0x120] sm:$0xff]  ;;  %v91_v51 = vld [vmem:[#allocation2 + $0x90] sm:$0xff] }
  0x36   :  { %709 = vmatprep.subr.mxu1 %v129_v30  ;;  %676 = vmatprep.subr.mxu0 %v96_v31  ;;  %v76_v49 = vld [vmem:[#allocation2 + $0x18] sm:$0xff]  ;;  %v75_v53 = vld [vmem:[#allocation2 + $0x10] sm:$0xff]  ;;  %v90_v55 = vld [vmem:[#allocation2 + $0x88] sm:$0xff] }
  0x37   :  { %710 = vmatpush3.msra.mxu1 %v113_v32  ;;  %677 = vmatpush3.msra.mxu0 %v80_v33  ;;  %v124_v50 = vld [vmem:[#allocation2 + $0x198] sm:$0xff]  ;;  %v123_v54 = vld [vmem:[#allocation2 + $0x190] sm:$0xff]  ;;  %v74_v57 = vld [vmem:[#allocation2 + $0x8] sm:$0xff] }
  0x38   :  { %711 = vmatprep.subr.mxu1 %v128_v34  ;;  %678 = vmatprep.subr.mxu0 %v95_v35  ;;  %v108_v52 = vld [vmem:[#allocation2 + $0x118] sm:$0xff]  ;;  %v107_v56 = vld [vmem:[#allocation2 + $0x110] sm:$0xff]  ;;  %v122_v58 = vld [vmem:[#allocation2 + $0x188] sm:$0xff] }
  0x39   :  { %712 = vmatpush3.msra.mxu1 %v112_v36  ;;  %679 = vmatpush3.msra.mxu0 %v79_v37  ;;  %v89_v59 = vld [vmem:[#allocation2 + $0x80] sm:$0xff]  ;;  %v68_v60 = vld [vmem:[%s997_s0 + $0x8] sm:$0xff]  ;;  %v168_v1 = vld [vmem:[#allocation2 + $0x2f8] sm:$0xff] }
  0x3a   :  { %713 = vmatprep.subr.mxu1 %v127_v38  ;;  %680 = vmatprep.subr.mxu0 %v94_v39  ;;  %v73_v61 = vld [vmem:[#allocation2] sm:$0xff]  ;;  %v106_v62 = vld [vmem:[#allocation2 + $0x108] sm:$0xff]  ;;  %v70_v3 = vld [vmem:[%s997_s0 + $0x18] sm:$0xff]  ;;  %v913_v39 = vmov 0.0  }
  0x3b   :  { %714 = vmatpush3.msra.mxu1 %v111_v40  ;;  %681 = vmatpush3.msra.mxu0 %v78_v41  ;;  %v67_v63 = vld [vmem:[%s997_s0] sm:$0xff]  ;;  %v152_v4 = vld [vmem:[#allocation2 + $0x278] sm:$0xff]  ;;  %v69_v5 = vld [vmem:[%s997_s0 + $0x10] sm:$0xff] }
  0x3c   :  { %715 = vmatprep.subr.mxu1 %v126_v42  ;;  %682 = vmatprep.subr.mxu0 %v93_v43  ;;  %v121_v0 = vld [vmem:[#allocation2 + $0x180] sm:$0xff]  ;;  %v167_v6 = vld [vmem:[#allocation2 + $0x2f0] sm:$0xff]  ;;  %v72_v8 = vld [vmem:[%s997_s0 + $0x28] sm:$0xff] }
  0x3d   :  { %716 = vmatpush3.msra.mxu1 %v110_v44  ;;  %683 = vmatpush3.msra.mxu0 %v77_v45  ;;  %v105_v2 = vld [vmem:[#allocation2 + $0x100] sm:$0xff]  ;;  %v151_v7 = vld [vmem:[#allocation2 + $0x270] sm:$0xff]  ;;  %v166_v9 = vld [vmem:[#allocation2 + $0x2e8] sm:$0xff] }
  0x3e   :  { %717 = vmatprep.subr.mxu1 %v125_v46  ;;  %684 = vmatprep.subr.mxu0 %v92_v47  ;;  %v150_v10 = vld [vmem:[#allocation2 + $0x268] sm:$0xff]  ;;  %v165_v11 = vld [vmem:[#allocation2 + $0x2e0] sm:$0xff]  ;;  %v164_v13 = vld [vmem:[#allocation2 + $0x2d8] sm:$0xff] }
  0x3f   :  { %718 = vmatpush3.msra.mxu1 %v109_v48  ;;  %685 = vmatpush3.msra.mxu0 %v76_v49  ;;  %v149_v12 = vld [vmem:[#allocation2 + $0x260] sm:$0xff]  ;;  %v148_v14 = vld [vmem:[#allocation2 + $0x258] sm:$0xff]  ;;  %v163_v15 = vld [vmem:[#allocation2 + $0x2d0] sm:$0xff] }
  0x40   :  { %719 = vmatprep.subr.mxu1 %v124_v50  ;;  %686 = vmatprep.subr.mxu0 %v91_v51  ;;  %v147_v16 = vld [vmem:[#allocation2 + $0x250] sm:$0xff]  ;;  %v162_v17 = vld [vmem:[#allocation2 + $0x2c8] sm:$0xff]  ;;  %v161_v19 = vld [vmem:[#allocation2 + $0x2c0] sm:$0xff] }
  0x41   :  { %720 = vmatpush3.msra.mxu1 %v108_v52  ;;  %687 = vmatpush3.msra.mxu0 %v75_v53  ;;  %v146_v18 = vld [vmem:[#allocation2 + $0x248] sm:$0xff]  ;;  %v145_v20 = vld [vmem:[#allocation2 + $0x240] sm:$0xff]  ;;  %v160_v21 = vld [vmem:[#allocation2 + $0x2b8] sm:$0xff] }
  0x42   :  { %721 = vmatprep.subr.mxu1 %v123_v54  ;;  %688 = vmatprep.subr.mxu0 %v90_v55  ;;  %v144_v22 = vld [vmem:[#allocation2 + $0x238] sm:$0xff]  ;;  %v159_v23 = vld [vmem:[#allocation2 + $0x2b0] sm:$0xff]  ;;  %v158_v25 = vld [vmem:[#allocation2 + $0x2a8] sm:$0xff] }
  0x43   :  { %722 = vmatpush3.msra.mxu1 %v107_v56  ;;  %689 = vmatpush3.msra.mxu0 %v74_v57  ;;  %v143_v24 = vld [vmem:[#allocation2 + $0x230] sm:$0xff]  ;;  %v142_v26 = vld [vmem:[#allocation2 + $0x228] sm:$0xff]  ;;  %v157_v27 = vld [vmem:[#allocation2 + $0x2a0] sm:$0xff] }
  0x44   :  { %723 = vmatprep.subr.mxu1 %v122_v58  ;;  %690 = vmatprep.subr.mxu0 %v89_v59  ;;  %v141_v28 = vld [vmem:[#allocation2 + $0x220] sm:$0xff]  ;;  %v156_v29 = vld [vmem:[#allocation2 + $0x298] sm:$0xff]  ;;  %v155_v31 = vld [vmem:[#allocation2 + $0x290] sm:$0xff] }
  0x45   :  { %240 = vmatprep.mubr.f32.mxu0 %v68_v60  ;;  %691 = vmatpush3.msra.mxu0 %v73_v61  ;;  %v140_v30 = vld [vmem:[#allocation2 + $0x218] sm:$0xff]  ;;  %v139_v32 = vld [vmem:[#allocation2 + $0x210] sm:$0xff]  ;;  %v154_v33 = vld [vmem:[#allocation2 + $0x288] sm:$0xff] }
  0x46   :  { %724 = vmatpush3.msra.mxu1 %v106_v62  ;;  %241 = vmatmul.mubr.f32.vlgmr.msra.gmra.mxu0 %v67_v63  ;;  %v138_v34 = vld [vmem:[#allocation2 + $0x208] sm:$0xff]  ;;  %v153_v35 = vld [vmem:[#allocation2 + $0x280] sm:$0xff]  ;;  %v415_v38 = vld [vmem:[#allocation4 + $0x78] sm:$0xff] }
  0x47   :  { %725 = vmatprep.subr.mxu1 %v121_v0  ;;  %730 = vmatprep.subr.mxu0 %v168_v1  ;;  %v137_v36 = vld [vmem:[#allocation2 + $0x200] sm:$0xff]  ;;  %v414_v40 = vld [vmem:[#allocation4 + $0x70] sm:$0xff]  ;;  %v413_v41 = vld [vmem:[#allocation4 + $0x68] sm:$0xff] }
  0x48   :  { %726 = vmatpush3.msra.mxu1 %v105_v2  ;;  %310 = vmatprep.mubr.f32.mxu1 %v70_v3  ;;  %v71_v37 = vld [vmem:[%s997_s0 + $0x20] sm:$0xff]  ;;  %v411_v43 = vld [vmem:[#allocation4 + $0x58] sm:$0xff]  ;;  %v410_v44 = vld [vmem:[#allocation4 + $0x50] sm:$0xff] }
  0x49   :  { %731 = vmatpush3.msra.mxu0 %v152_v4  ;;  %311 = vmatmul.mubr.f32.vlgmr.msra.gmra.mxu1 %v69_v5  ;;  %v412_v42 = vld [vmem:[#allocation4 + $0x60] sm:$0xff]  ;;  %v409_v45 = vld [vmem:[#allocation4 + $0x48] sm:$0xff]  ;;  %v407_v47 = vld [vmem:[#allocation4 + $0x38] sm:$0xff] }
  0x4a   :  { %732 = vmatprep.subr.mxu0 %v167_v6  ;;  %380 = vmatprep.mubr.f32.mxu0 %v72_v8  ;;  %v408_v46 = vld [vmem:[#allocation4 + $0x40] sm:$0xff]  ;;  %v406_v48 = vld [vmem:[#allocation4 + $0x30] sm:$0xff]  ;;  %v405_v49 = vld [vmem:[#allocation4 + $0x28] sm:$0xff] }
  0x4b   :  { %733 = vmatpush3.msra.mxu0 %v151_v7  ;;  %782 = vmatprep.subr.mxu1 %v913_v39  ;;  %v404_v50 = vld [vmem:[#allocation4 + $0x20] sm:$0xff]  ;;  %v403_v51 = vld [vmem:[#allocation4 + $0x18] sm:$0xff]  ;;  %v402_v52 = vld [vmem:[#allocation4 + $0x10] sm:$0xff] }
  0x4c   :  { %734 = vmatprep.subr.mxu0 %v166_v9  ;;  %814 = vmatprep.mubr.msk.f32.mxu1 %vm914_vm0, %v913_v39  ;;  %v401_v53 = vld [vmem:[#allocation4 + $0x8] sm:$0xff]  ;;  %v400_v54 = vld [vmem:[#allocation4] sm:$0xff] }
  0x4d   :  { %735 = vmatpush3.msra.mxu0 %v150_v10  ;;  %783 = vmatpush3.msra.mxu1 %v415_v38  ;;  %v658_v59 = vld [vmem:[%s999_s2] ss:$0 sm:$0xff]  ;;  %v516_v38 = vld [vmem:[#allocation6 + $0x48] sm:$0xff] }
  0x4e   :  { %736 = vmatprep.subr.mxu0 %v165_v11  ;;  %784 = vmatprep.subr.mxu1 %v913_v39 }
  0x4f   :  { %737 = vmatpush3.msra.mxu0 %v149_v12  ;;  %785 = vmatpush3.msra.mxu1 %v414_v40  ;;  %v514_v40 = vld [vmem:[#allocation6 + $0x38] sm:$0xff] }
  0x50   :  { %738 = vmatprep.subr.mxu0 %v164_v13  ;;  %786 = vmatprep.subr.mxu1 %v913_v39 }
  0x51   :  { %739 = vmatpush3.msra.mxu0 %v148_v14  ;;  %787 = vmatpush3.msra.mxu1 %v413_v41  ;;  %v513_v41 = vld [vmem:[#allocation6 + $0x30] sm:$0xff] }
  0x52   :  { %740 = vmatprep.subr.mxu0 %v163_v15  ;;  %788 = vmatprep.subr.mxu1 %v913_v39 }
  0x53   :  { %741 = vmatpush3.msra.mxu0 %v147_v16  ;;  %789 = vmatpush3.msra.mxu1 %v412_v42  ;;  %v538_v16 = vld [vmem:[#allocation6 + $0xf8] sm:$0xff]  ;;  %v512_v42 = vld [vmem:[#allocation6 + $0x28] sm:$0xff] }
  0x54   :  { %742 = vmatprep.subr.mxu0 %v162_v17  ;;  %790 = vmatprep.subr.mxu1 %v913_v39  ;;  %v537_v17 = vld [vmem:[#allocation6 + $0xf0] sm:$0xff] }
  0x55   :  { %743 = vmatpush3.msra.mxu0 %v146_v18  ;;  %791 = vmatpush3.msra.mxu1 %v411_v43  ;;  %v536_v18 = vld [vmem:[#allocation6 + $0xe8] sm:$0xff]  ;;  %v511_v43 = vld [vmem:[#allocation6 + $0x20] sm:$0xff] }
  0x56   :  { %744 = vmatprep.subr.mxu0 %v161_v19  ;;  %792 = vmatprep.subr.mxu1 %v913_v39  ;;  %v535_v19 = vld [vmem:[#allocation6 + $0xe0] sm:$0xff] }
  0x57   :  { %745 = vmatpush3.msra.mxu0 %v145_v20  ;;  %793 = vmatpush3.msra.mxu1 %v410_v44  ;;  %v534_v20 = vld [vmem:[#allocation6 + $0xd8] sm:$0xff] }
  0x58   :  { %746 = vmatprep.subr.mxu0 %v160_v21  ;;  %794 = vmatprep.subr.mxu1 %v913_v39  ;;  %v533_v21 = vld [vmem:[#allocation6 + $0xd0] sm:$0xff]  ;;  %v510_v44 = vld [vmem:[#allocation6 + $0x18] sm:$0xff] }
  0x59   :  { %747 = vmatpush3.msra.mxu0 %v144_v22  ;;  %795 = vmatpush3.msra.mxu1 %v409_v45  ;;  %v532_v22 = vld [vmem:[#allocation6 + $0xc8] sm:$0xff]  ;;  %v509_v45 = vld [vmem:[#allocation6 + $0x10] sm:$0xff] }
  0x5a   :  { %748 = vmatprep.subr.mxu0 %v159_v23  ;;  %796 = vmatprep.subr.mxu1 %v913_v39  ;;  %v531_v23 = vld [vmem:[#allocation6 + $0xc0] sm:$0xff] }
  0x5b   :  { %749 = vmatpush3.msra.mxu0 %v143_v24  ;;  %797 = vmatpush3.msra.mxu1 %v408_v46  ;;  %v530_v24 = vld [vmem:[#allocation6 + $0xb8] sm:$0xff]  ;;  %v508_v46 = vld [vmem:[#allocation6 + $0x8] sm:$0xff] }
  0x5c   :  { %750 = vmatprep.subr.mxu0 %v158_v25  ;;  %798 = vmatprep.subr.mxu1 %v913_v39  ;;  %v529_v25 = vld [vmem:[#allocation6 + $0xb0] sm:$0xff] }
  0x5d   :  { %751 = vmatpush3.msra.mxu0 %v142_v26  ;;  %799 = vmatpush3.msra.mxu1 %v407_v47  ;;  %v528_v26 = vld [vmem:[#allocation6 + $0xa8] sm:$0xff]  ;;  %v507_v47 = vld [vmem:[#allocation6] sm:$0xff] }
  0x5e   :  { %752 = vmatprep.subr.mxu0 %v157_v27  ;;  %800 = vmatprep.subr.mxu1 %v913_v39  ;;  %v527_v27 = vld [vmem:[#allocation6 + $0xa0] sm:$0xff] }
  0x5f   :  { %753 = vmatpush3.msra.mxu0 %v141_v28  ;;  %801 = vmatpush3.msra.mxu1 %v406_v48  ;;  %v526_v28 = vld [vmem:[#allocation6 + $0x98] sm:$0xff]  ;;  %v659_v48 = vld [vmem:[%s1001_s4] ss:$0 sm:$0xff] }
  0x60   :  { %754 = vmatprep.subr.mxu0 %v156_v29  ;;  %802 = vmatprep.subr.mxu1 %v913_v39  ;;  %v525_v29 = vld [vmem:[#allocation6 + $0x90] sm:$0xff] }
  0x61   :  { %755 = vmatpush3.msra.mxu0 %v140_v30  ;;  %803 = vmatpush3.msra.mxu1 %v405_v49  ;;  %v524_v30 = vld [vmem:[#allocation6 + $0x88] sm:$0xff] }
  0x62   :  { %756 = vmatprep.subr.mxu0 %v155_v31  ;;  %804 = vmatprep.subr.mxu1 %v913_v39  ;;  %v523_v31 = vld [vmem:[#allocation6 + $0x80] sm:$0xff] }
  0x63   :  { %757 = vmatpush3.msra.mxu0 %v139_v32  ;;  %805 = vmatpush3.msra.mxu1 %v404_v50  ;;  %v522_v32 = vld [vmem:[#allocation6 + $0x78] sm:$0xff] }
  0x64   :  { %758 = vmatprep.subr.mxu0 %v154_v33  ;;  %806 = vmatprep.subr.mxu1 %v913_v39  ;;  %v521_v33 = vld [vmem:[#allocation6 + $0x70] sm:$0xff] }
  0x65   :  { %759 = vmatpush3.msra.mxu0 %v138_v34  ;;  %807 = vmatpush3.msra.mxu1 %v403_v51  ;;  %v520_v34 = vld [vmem:[#allocation6 + $0x68] sm:$0xff] }
  0x66   :  { %760 = vmatprep.subr.mxu0 %v153_v35  ;;  %808 = vmatprep.subr.mxu1 %v913_v39  ;;  %v519_v35 = vld [vmem:[#allocation6 + $0x60] sm:$0xff] }
  0x67   :  { %761 = vmatpush3.msra.mxu0 %v137_v36  ;;  %809 = vmatpush3.msra.mxu1 %v402_v52  ;;  %v518_v36 = vld [vmem:[#allocation6 + $0x58] sm:$0xff] }
  0x68   :  { %381 = vmatmul.mubr.f32.vlgmr.msra.gmra.mxu0 %v71_v37  ;;  %810 = vmatprep.subr.mxu1 %v913_v39  ;;  %v517_v37 = vld [vmem:[#allocation6 + $0x50] sm:$0xff] }
  0x69   :  { %615 = vmatprep.mubr.f32.mxu0 %v913_v39  ;;  %811 = vmatpush3.msra.mxu1 %v401_v53 }
  0x6a   :  { %812 = vmatprep.subr.mxu1 %v913_v39  ;;  %551 = vmatprep.subr.mxu0 %v538_v16  ;;  %v515_v39 = vld [vmem:[#allocation6 + $0x40] sm:$0xff] }
  0x6b   :  { %813 = vmatpush3.msra.mxu1 %v400_v54  ;;  %552 = vmatpush1.msra.mxu0 %v537_v17 }
  0x6c   :  { %553 = vmatprep.subr.mxu0 %v536_v18 }
  0x6d   :  { %554 = vmatpush1.msra.mxu0 %v535_v19 }
  0x6e   :  { %555 = vmatprep.subr.mxu0 %v534_v20 }
  0x6f   :  { %556 = vmatpush1.msra.mxu0 %v533_v21 }
  0x70   :  { %557 = vmatprep.subr.mxu0 %v532_v22 }
  0x71   :  { %558 = vmatpush1.msra.mxu0 %v531_v23 }
  0x72   :  { %559 = vmatprep.subr.mxu0 %v530_v24 }
  0x73   :  { %560 = vmatpush1.msra.mxu0 %v529_v25 }
  0x74   :  { %561 = vmatprep.subr.mxu0 %v528_v26 }
  0x75   :  { %562 = vmatpush1.msra.mxu0 %v527_v27 }
  0x76   :  { %563 = vmatprep.subr.mxu0 %v526_v28 }
  0x77   :  { %564 = vmatpush1.msra.mxu0 %v525_v29 }
  0x78   :  { %565 = vmatprep.subr.mxu0 %v524_v30 }
  0x79   :  { %566 = vmatpush1.msra.mxu0 %v523_v31 }
  0x7a   :  { %567 = vmatprep.subr.mxu0 %v522_v32 }
  0x7b   :  { %568 = vmatpush1.msra.mxu0 %v521_v33 }
  0x7c   :  { %569 = vmatprep.subr.mxu0 %v520_v34 }
  0x7d   :  { %570 = vmatpush1.msra.mxu0 %v519_v35 }
  0x7e   :  { %571 = vmatprep.subr.mxu0 %v518_v36 }
  0x7f   :  { %572 = vmatpush1.msra.mxu0 %v517_v37 }
  0x80   :  { %573 = vmatprep.subr.mxu0 %v516_v38 }
  0x81   :  { %574 = vmatpush1.msra.mxu0 %v515_v39 }
  0x82   :  { %575 = vmatprep.subr.mxu0 %v514_v40 }
  0x83   :  { %576 = vmatpush1.msra.mxu0 %v513_v41 }
  0x84   :  { %577 = vmatprep.subr.mxu0 %v512_v42 }
  0x85   :  { %578 = vmatpush1.msra.mxu0 %v511_v43 }
  0x86   :  { %579 = vmatprep.subr.mxu0 %v510_v44 }
  0x87   :  { %580 = vmatpush1.msra.mxu0 %v509_v45 }
  0x88   :  { %581 = vmatprep.subr.mxu0 %v508_v46 }
  0x89   :  { %582 = vmatpush1.msra.mxu0 %v507_v47 }
 0x106   :  { %v692_v55 = vpop.f32.mrf.mxu0 }
 0x108   :  { %v693_v56 = vpop.f32.mrf.mxu0 }
 0x109   :  { %v727_v57 = vpop.f32.mrf.mxu1  ;;  %v694_v58 = vadd.f32 %v693_v56, %v692_v55 }
 0x10b   :  { %v728_v60 = vpop.f32.mrf.mxu1  ;;  %v243_v61 = vadd.f32 %v694_v58, %v658_v59 }
 0x10c   :  { %v729_v62 = vadd.f32 %v728_v60, %v727_v57 }
 0x10e   :  { %v313_v1 = vadd.f32 %v729_v62, %v243_v61 }
 0x128   :  { %v762_v63 = vpop.f32.mrf.mxu0 }
 0x12a   :  { %v763_v0 = vpop.f32.mrf.mxu0 }
 0x12b   :  { %v764_v2 = vadd.f32 %v763_v0, %v762_v63  ;;  %v541_v0 = vlaneseq }
 0x12d   :  { %v383_v3 = vadd.f32 %v764_v2, %v313_v1  ;;  %v542_v1 = vshrl.u32 %v541_v0, 7 }
 0x12f   :  { %v387_v4 = vmin.f32 %v383_v3, 20.0  ;;  %vm386_vm2 = vcmp.gt.f32.partialorder %v383_v3, 20.0  ;;  %v543_v2 = vsub.s32 0, %v542_v1 }
 0x131   :  { %v388_v5 = vmul.f32 1.442695, %v387_v4  ;;  %v547_v4 = vsub.s32 1, %v542_v1 }
 0x133   :  { %826 = vpow2.f32 %v388_v5 }
 0x140   :  { %v827_v6 = vpop.eup %826 }
 0x141   :  { %v390_v7 = vadd.f32 1.0, %v827_v6  ;;  %v393_v8 = vmul.f32 -0.5, %v827_v6  ;;  %v396_v10 = vand.u32 2147483647, %v827_v6 }
 0x143   :  { %828 = vlog2.f32 %v390_v7  ;;  %v394_v9 = vadd.f32 1.0, %v393_v8  ;;  %vm397_vm1 = vcmp.lt.f32.partialorder %v396_v10, 0.0004427343 }
 0x145   :  { %v395_v13 = vmul.f32 %v827_v6, %v394_v9 }
 0x150   :  { %v829_v11 = vpop.eup %828 }
 0x151   :  { %v392_v12 = vmul.f32 0.6931472, %v829_v11 }
 0x153   :  { %v398_v14 = vsel %vm397_vm1, %v395_v13, %v392_v12 }
 0x154   :  { %v399_v15 = vsel %vm386_vm2, %v383_v3, %v398_v14  ;;  %v539_v3 = vld [vmem:[%s1003_s6] sm:$0x3] }
 0x155   :  { %815 = vmatmul.mubr.f32.vlgmr.msra.gmra.mxu1 %v399_v15  ;;  %v544_v5 = vrot.slane %v539_v3, %v543_v2  ;;  %v548_v6 = vrot.slane %v539_v3, %v547_v4 }
 0x215   :  { %v489_v49 = vpop.f32.mrf.mxu1 }
 0x216   :  { %v490_v50 = vadd.f32 %v659_v48, %v489_v49 }
 0x217   :  { %v816_v51 = vpop.f32.mrf.mxu1 }
 0x218   :  { %v494_v52 = vmin.f32 %v490_v50, 20.0  ;;  %vm493_vm4 = vcmp.gt.f32.partialorder %v490_v50, 20.0 }
 0x21a   :  { %v495_v53 = vmul.f32 1.442695, %v494_v52 }
 0x21c   :  { %830 = vpow2.f32 %v495_v53 }
 0x229   :  { %v831_v54 = vpop.eup %830 }
 0x22a   :  { %v497_v55 = vadd.f32 1.0, %v831_v54  ;;  %v500_v56 = vmul.f32 -0.5, %v831_v54  ;;  %v503_v58 = vand.u32 2147483647, %v831_v54 }
 0x22c   :  { %832 = vlog2.f32 %v497_v55  ;;  %v501_v57 = vadd.f32 1.0, %v500_v56  ;;  %vm504_vm3 = vcmp.lt.f32.partialorder %v503_v58, 0.0004427343 }
 0x22e   :  { %v502_v61 = vmul.f32 %v831_v54, %v501_v57 }
 0x239   :  { %v833_v59 = vpop.eup %832 }
 0x23a   :  { %v499_v60 = vmul.f32 0.6931472, %v833_v59 }
 0x23c   :  { %v505_v62 = vsel %vm504_vm3, %v502_v61, %v499_v60 }
 0x23d   :  { %v506_v63 = vsel %vm493_vm4, %v490_v50, %v505_v62 }
 0x23e   :  { %616 = vmatmul.mubr.f32.vlgmr.msra.gmra.mxu0 %v506_v63 }
 0x2fe   :  { %v617_v7 = vpop.f32.mrf.mxu0 }
 0x2ff   :  { %v618_v8 = vadd.f32 %v617_v7, %v544_v5 }
 0x300   :  { %v619_v9 = vpop.f32.mrf.mxu0 }
 0x301   :  { %v624_v10 = vmin.f32 %v618_v8, 20.0  ;;  %v620_v11 = vadd.f32 %v619_v9, %v548_v6  ;;  %vm622_vm6 = vcmp.gt.f32.partialorder %v618_v8, 20.0 }
 0x303   :  { %v626_v12 = vmul.f32 1.442695, %v624_v10  ;;  %v625_v13 = vmin.f32 %v620_v11, 20.0  ;;  %vm623_vm8 = vcmp.gt.f32.partialorder %v620_v11, 20.0 }
 0x305   :  { %834 = vpow2.f32 %v626_v12  ;;  %v628_v14 = vmul.f32 1.442695, %v625_v13 }
 0x307   :  { %836 = vpow2.f32 %v628_v14 }
 0x312   :  { %v835_v15 = vpop.eup %834 }
 0x313   :  { %v630_v16 = vadd.f32 1.0, %v835_v15  ;;  %v633_v19 = vmul.f32 -0.5, %v835_v15  ;;  %v636_v22 = vand.u32 2147483647, %v835_v15 }
 0x314   :  { %v837_v17 = vpop.eup %836 }
 0x315   :  { %838 = vlog2.f32 %v630_v16  ;;  %v639_v18 = vadd.f32 1.0, %v837_v17  ;;  %v642_v20 = vmul.f32 -0.5, %v837_v17  ;;  %v634_v21 = vadd.f32 1.0, %v633_v19 }
 0x316   :  { %v645_v25 = vand.u32 2147483647, %v837_v17  ;;  %vm637_vm5 = vcmp.lt.f32.partialorder %v636_v22, 0.0004427343 }
 0x317   :  { %840 = vlog2.f32 %v639_v18  ;;  %v643_v23 = vadd.f32 1.0, %v642_v20  ;;  %v635_v27 = vmul.f32 %v835_v15, %v634_v21 }
 0x318   :  { %vm646_vm7 = vcmp.lt.f32.partialorder %v645_v25, 0.0004427343 }
 0x319   :  { %v644_v31 = vmul.f32 %v837_v17, %v643_v23 }
 0x322   :  { %v839_v24 = vpop.eup %838 }
 0x323   :  { %v632_v26 = vmul.f32 0.6931472, %v839_v24 }
 0x324   :  { %v841_v28 = vpop.eup %840 }
 0x325   :  { %v638_v29 = vsel %vm637_vm5, %v635_v27, %v632_v26  ;;  %v641_v30 = vmul.f32 0.6931472, %v841_v28 }
 0x326   :  { %v648_v32 = vsel %vm622_vm6, %v618_v8, %v638_v29 }
 0x327   :  { %650 = vst [vmem:[%s1004_s7] sm:$0xff] %v648_v32  ;;  %v647_v33 = vsel %vm646_vm7, %v644_v31, %v641_v30 }
 0x328   :  { %v649_v34 = vsel %vm623_vm8, %v620_v11, %v647_v33 }
 0x329   :  { %651 = vst [vmem:[%s1004_s7 + $0x8] sm:$0xff] %v649_v34 }
 0x32a   :  { %656 = vsyncpa [#allocation3], 1 }
 0x32b   :  { %657 = vsyncpa [#allocation5], 1 }

</bundles_post_ra>
